<compile_context>
chip_gen: v6e
topology: v6e:2x2x1
jax: 0.10.0
libtpu: 0.0.40
codegen_flags: <defaults>
</compile_context>

<pallas_src>
import jax
import jax.numpy as jnp
import numpy as np
from jax.experimental import pallas as pl
from jax.experimental.pallas import tpu as pltpu

# ---------------------------------------------------------------------------
# Problem sizes (small, consistent with the module's forward)
# ---------------------------------------------------------------------------
B = 2
OUT_DIM = 4          # channels of input1 and of the output
CHANNEL = 8          # channels of input2
H1, W1 = 16, 16      # spatial of input1; input2 / output spatial is 2*H1 x 2*W1
BN_EPS = 1e-3        # both BatchNorms in the module use eps=0.001

PARAM_COLS = 128     # lane-aligned width of the fused parameter slab


# ---------------------------------------------------------------------------
# Pallas kernel: one invocation, fully fused in VMEM.
# ---------------------------------------------------------------------------
def idaup_kernel(x1_ref,     # (B*OUT_DIM, H1*W1)     f32  rows=(b,c),  lanes=(i,j)
                 x2_ref,     # (B*CHANNEL, 4*H1*W1)   bf16 rows=(b,ci), lanes=(kh,kw,i,j)
                 p_ref,      # (B*OUT_DIM, 128)       f32  fused parameter slab
                 out_ref):   # (B*OUT_DIM, 4*H1*W1)   f32  rows=(b,c),  lanes=(kh,kw,i,j)
    kdim = x2_ref.shape[0]                      # B*CHANNEL

    # -------- unpack the single parameter slab (static, zero-cost slices) ----
    us = p_ref[:, 0:4]                          # (8,4) tap weight * up BN scale
    ub = p_ref[:, 4:5]                          # (8,1) up-path folded BN bias
    cs = p_ref[:, 5:6]                          # (8,1) conv-path folded BN scale
    cb = p_ref[:, 6:7]                          # (8,1) conv-path folded BN bias
    wb = p_ref[:, 8:8 + kdim].astype(jnp.bfloat16)   # (8,16) block-diag 1x1 weight

    # -------- conv path: ONE MXU dot, both batches via block-diagonal weight -
    y = jnp.dot(wb, x2_ref[...], preferred_element_type=jnp.float32)  # (8, 1024)
    y = jnp.maximum(y * cs + cb, 0.0)

    # -------- up path: depthwise transposed conv (k=2,s=2) == per-tap scale --
    # Tap t = kh*2+kw is a contiguous, 128-aligned 256-lane slab of the output.
    x1 = x1_ref[...]                            # (8, 256)
    n = x1.shape[1]
    ubb = jnp.broadcast_to(ub, x1.shape)        # hoisted: emitted once, not 4x
    for t in range(4):                          # unrolled, static
        up_t = jnp.maximum(x1 * us[:, t:t + 1] + ubb, 0.0)
        out_ref[:, t * n:(t + 1) * n] = up_t + y[:, t * n:(t + 1) * n]


# ---------------------------------------------------------------------------
# Wrapper: NCHW in / NCHW out.
# ---------------------------------------------------------------------------
def _full_spec(shape):
    nd = len(shape)
    return pl.BlockSpec(shape, lambda i, _nd=nd: (0,) * _nd)


@jax.jit
def idaup_forward(x1_nchw, x2_nchw, param_slab):
    b, c_out, h1, w1 = x1_nchw.shape
    _, c_in, h2, w2 = x2_nchw.shape            # h2 = 2*h1, w2 = 2*w1
    s1 = h1 * w1

    # x1 rows are already (b, c): pure reshape, no transpose.
    x1_flat = x1_nchw.astype(jnp.float32).reshape(b * c_out, s1)

    # x2: cast to bf16 first (halves traffic), then space-to-depth sub-grid:
    # (b, ci, i, kh, j, kw) -> rows (b, ci), lanes (kh, kw, i, j)
    x2_bf = x2_nchw.astype(jnp.bfloat16).reshape(b, c_in, h1, 2, w1, 2)
    x2_cm = jnp.transpose(x2_bf, (0, 1, 3, 5, 2, 4)).reshape(b * c_in, 4 * s1)

    out_cm = pl.pallas_call(
        idaup_kernel,
        out_shape=jax.ShapeDtypeStruct((b * c_out, 4 * s1), jnp.float32),
        grid_spec=pltpu.PrefetchScalarGridSpec(
            num_scalar_prefetch=0,
            grid=(1,),                                   # single step: tiny problem
            in_specs=[_full_spec((b * c_out, s1)),
                      _full_spec((b * c_in, 4 * s1)),
                      _full_spec((b * c_out, PARAM_COLS))],
            out_specs=_full_spec((b * c_out, 4 * s1)),
        ),
        compiler_params=pltpu.CompilerParams(
            dimension_semantics=("arbitrary",)),
    )(x1_flat, x2_cm, param_slab)

    # sub-grid (b, c, kh, kw, i, j) -> NCHW (b, c, 2i+kh, 2j+kw)
    out = out_cm.reshape(b, c_out, 2, 2, h1, w1)
    out = jnp.transpose(out, (0, 1, 4, 2, 5, 3)).reshape(b, c_out, h2, w2)
    return out


# ---------------------------------------------------------------------------
# Deterministic parameters (folded BatchNorm, eval semantics) + fused slab.
# The slab is built once, outside jit (load-time work in a real deployment).
# ---------------------------------------------------------------------------
def make_params(key, batch=B):
    ks = jax.random.split(key, 10)
    u = lambda k, shp, lo=-0.5, hi=0.5: jax.random.uniform(k, shp, jnp.float32, lo, hi)

    def fold_bn(kg, kb, km, kv, c):
        gamma = u(kg, (c,), 0.5, 1.5)
        beta = u(kb, (c,))
        mean = u(km, (c,))
        var = u(kv, (c,), 0.5, 1.5)
        scale = gamma / jnp.sqrt(var + BN_EPS)
        bias = beta - mean * scale
        return scale, bias

    # ConvTranspose2d weight, torch shape (out_dim, 1, 2, 2) -> (out_dim, 2, 2)
    w_up = u(ks[0], (OUT_DIM, 2, 2))
    up_s, up_b = fold_bn(ks[1], ks[2], ks[3], ks[4], OUT_DIM)

    # Conv2d 1x1 weight, torch shape (out_dim, channel, 1, 1) -> (out_dim, channel)
    w_conv = u(ks[5], (OUT_DIM, CHANNEL)) * 0.5
    conv_s, conv_b = fold_bn(ks[6], ks[7], ks[8], ks[9], OUT_DIM)

    # ---- fused, lane-aligned parameter slab: ONE DMA for all params ---------
    up_scale = w_up.reshape(OUT_DIM, 4) * up_s[:, None]                 # (C_out, 4)
    w_block = jnp.kron(jnp.eye(batch, dtype=jnp.float32), w_conv)       # (B*C_out, B*C_in)
    slab = jnp.zeros((batch * OUT_DIM, PARAM_COLS), jnp.float32)
    slab = slab.at[:, 0:4].set(jnp.tile(up_scale, (batch, 1)))
    slab = slab.at[:, 4].set(jnp.tile(up_b, batch))
    slab = slab.at[:, 5].set(jnp.tile(conv_s, batch))
    slab = slab.at[:, 6].set(jnp.tile(conv_b, batch))
    slab = slab.at[:, 8:8 + batch * CHANNEL].set(w_block)

    return dict(
        # raw params (reference path)
        w_up=w_up, up_s=up_s, up_b=up_b,
        w_conv=w_conv, conv_s=conv_s, conv_b=conv_b,
        # fused kernel parameter slab
        slab=slab,
    )


# ---------------------------------------------------------------------------
# Pure-JAX reference (matches the PyTorch module in eval mode)
# ---------------------------------------------------------------------------
def idaup_ref(x1, x2, p):
    b, c, h, w = x1.shape
    # depthwise ConvTranspose2d k=2, s=2 (taps never overlap)
    up6 = x1[:, :, :, None, :, None] * p["w_up"][None, :, None, :, None, :]
    up = up6.reshape(b, c, 2 * h, 2 * w)
    up = up * p["up_s"][None, :, None, None] + p["up_b"][None, :, None, None]
    up = jnp.maximum(up, 0.0)

    y = jnp.einsum("bchw,oc->bohw", x2, p["w_conv"],
                   precision=jax.lax.Precision.HIGHEST)
    y = y * p["conv_s"][None, :, None, None] + p["conv_b"][None, :, None, None]
    y = jnp.maximum(y, 0.0)
    return up + y


if __name__ == "__main__":
    key = jax.random.PRNGKey(0)
    k1, k2, kp = jax.random.split(key, 3)
    x1 = jax.random.normal(k1, (B, OUT_DIM, H1, W1), jnp.float32)        # NCHW
    x2 = jax.random.normal(k2, (B, CHANNEL, 2 * H1, 2 * W1), jnp.float32)
    params = make_params(kp)

    out = jax.block_until_ready(idaup_forward(x1, x2, params["slab"]))
    ref = jax.block_until_ready(idaup_ref(x1, x2, params))
    # Tolerance reflects the deliberate bf16 conv-path operands (per perf
    # review); the f32 reference uses Precision.HIGHEST.
    np.testing.assert_allclose(np.asarray(out), np.asarray(ref),
                               rtol=1e-2, atol=1e-2)
    print("KERNEL_OK")
</pallas_src>

<mosaic_0001>
module attributes {stable_mosaic.version = 11 : i64} {
  func.func @idaup_kernel(%arg0: i32, %arg1: memref<8x256xf32, #tpu.memory_space<vmem>>, %arg2: memref<16x1024xbf16, #tpu.memory_space<vmem>>, %arg3: memref<8x128xf32, #tpu.memory_space<vmem>>, %arg4: memref<8x1024xf32, #tpu.memory_space<vmem>>) attributes {dimension_semantics = [#tpu.dimension_semantics<arbitrary>], iteration_bounds = array<i64: 1>, scalar_prefetch = 0 : i64, scratch_operands = 0 : i64, tpu.core_type = #tpu.core_type<tc>, window_params = [{pipeline_mode = #tpu.pipeline_mode<synchronous>, transform_indices = @transform_0, window_bounds = array<i64: 8, 256>}, {pipeline_mode = #tpu.pipeline_mode<synchronous>, transform_indices = @transform_1, window_bounds = array<i64: 16, 1024>}, {pipeline_mode = #tpu.pipeline_mode<synchronous>, transform_indices = @transform_2, window_bounds = array<i64: 8, 128>}, {pipeline_mode = #tpu.pipeline_mode<synchronous>, transform_indices = @transform_3, window_bounds = array<i64: 8, 1024>}]} {
    %c0 = arith.constant 0 : index
    %c0_0 = arith.constant 0 : index
    %0 = vector.load %arg3[%c0, %c0_0] : memref<8x128xf32, #tpu.memory_space<vmem>>, vector<8x4xf32>
    %c0_1 = arith.constant 0 : index
    %c4 = arith.constant 4 : index
    %1 = vector.load %arg3[%c0_1, %c4] : memref<8x128xf32, #tpu.memory_space<vmem>>, vector<8x1xf32>
    %c0_2 = arith.constant 0 : index
    %c5 = arith.constant 5 : index
    %2 = vector.load %arg3[%c0_2, %c5] : memref<8x128xf32, #tpu.memory_space<vmem>>, vector<8x1xf32>
    %c0_3 = arith.constant 0 : index
    %c6 = arith.constant 6 : index
    %3 = vector.load %arg3[%c0_3, %c6] : memref<8x128xf32, #tpu.memory_space<vmem>>, vector<8x1xf32>
    %c0_4 = arith.constant 0 : index
    %c8 = arith.constant 8 : index
    %4 = vector.load %arg3[%c0_4, %c8] : memref<8x128xf32, #tpu.memory_space<vmem>>, vector<8x16xf32>
    %5 = arith.truncf %4 : vector<8x16xf32> to vector<8x16xbf16>
    %c0_5 = arith.constant 0 : index
    %c0_6 = arith.constant 0 : index
    %6 = vector.load %arg2[%c0_5, %c0_6] : memref<16x1024xbf16, #tpu.memory_space<vmem>>, vector<16x1024xbf16>
    %cst = arith.constant dense<0.000000e+00> : vector<8x1024xf32>
    %7 = tpu.matmul %5, %6, %cst {dimension_numbers = #tpu.dot_dimension_numbers<[1], [0], [0], [1], [0, 0, 1, 1], [], []>} : vector<8x16xbf16>, vector<16x1024xbf16>, vector<8x1024xf32> -> vector<8x1024xf32>
    %8 = vector.broadcast %2 : vector<8x1xf32> to vector<8x1024xf32>
    %9 = arith.mulf %7, %8 : vector<8x1024xf32>
    %10 = vector.broadcast %3 : vector<8x1xf32> to vector<8x1024xf32>
    %11 = arith.addf %9, %10 : vector<8x1024xf32>
    %cst_7 = arith.constant 0.000000e+00 : f32
    %12 = vector.broadcast %cst_7 : f32 to vector<8x1024xf32>
    %13 = arith.maximumf %11, %12 : vector<8x1024xf32>
    %c0_8 = arith.constant 0 : index
    %c0_9 = arith.constant 0 : index
    %14 = vector.load %arg1[%c0_8, %c0_9] : memref<8x256xf32, #tpu.memory_space<vmem>>, vector<8x256xf32>
    %15 = vector.shape_cast %1 : vector<8x1xf32> to vector<8x1xf32>
    %16 = vector.broadcast %15 : vector<8x1xf32> to vector<8x256xf32>
    %17 = vector.extract_strided_slice %0 {offsets = [0, 0], sizes = [8, 1], strides = [1, 1]} : vector<8x4xf32> to vector<8x1xf32>
    %18 = vector.broadcast %17 : vector<8x1xf32> to vector<8x256xf32>
    %19 = arith.mulf %14, %18 : vector<8x256xf32>
    %20 = arith.addf %19, %16 : vector<8x256xf32>
    %cst_10 = arith.constant 0.000000e+00 : f32
    %21 = vector.broadcast %cst_10 : f32 to vector<8x256xf32>
    %22 = arith.maximumf %20, %21 : vector<8x256xf32>
    %23 = vector.extract_strided_slice %13 {offsets = [0, 0], sizes = [8, 256], strides = [1, 1]} : vector<8x1024xf32> to vector<8x256xf32>
    %24 = arith.addf %22, %23 : vector<8x256xf32>
    %c0_11 = arith.constant 0 : index
    %c0_12 = arith.constant 0 : index
    %25 = vector.load %arg4[%c0_11, %c0_12] : memref<8x1024xf32, #tpu.memory_space<vmem>>, vector<8x256xf32>
    tpu.vector_store %arg4[%c0_11, %c0_12], %24 {strides = array<i32>} : memref<8x1024xf32, #tpu.memory_space<vmem>>, vector<8x256xf32>,
    %26 = vector.extract_strided_slice %0 {offsets = [0, 1], sizes = [8, 1], strides = [1, 1]} : vector<8x4xf32> to vector<8x1xf32>
    %27 = vector.broadcast %26 : vector<8x1xf32> to vector<8x256xf32>
    %28 = arith.mulf %14, %27 : vector<8x256xf32>
    %29 = arith.addf %28, %16 : vector<8x256xf32>
    %cst_13 = arith.constant 0.000000e+00 : f32
    %30 = vector.broadcast %cst_13 : f32 to vector<8x256xf32>
    %31 = arith.maximumf %29, %30 : vector<8x256xf32>
    %32 = vector.extract_strided_slice %13 {offsets = [0, 256], sizes = [8, 256], strides = [1, 1]} : vector<8x1024xf32> to vector<8x256xf32>
    %33 = arith.addf %31, %32 : vector<8x256xf32>
    %c0_14 = arith.constant 0 : index
    %c256 = arith.constant 256 : index
    %34 = vector.load %arg4[%c0_14, %c256] : memref<8x1024xf32, #tpu.memory_space<vmem>>, vector<8x256xf32>
    tpu.vector_store %arg4[%c0_14, %c256], %33 {strides = array<i32>} : memref<8x1024xf32, #tpu.memory_space<vmem>>, vector<8x256xf32>,
    %35 = vector.extract_strided_slice %0 {offsets = [0, 2], sizes = [8, 1], strides = [1, 1]} : vector<8x4xf32> to vector<8x1xf32>
    %36 = vector.broadcast %35 : vector<8x1xf32> to vector<8x256xf32>
    %37 = arith.mulf %14, %36 : vector<8x256xf32>
    %38 = arith.addf %37, %16 : vector<8x256xf32>
    %cst_15 = arith.constant 0.000000e+00 : f32
    %39 = vector.broadcast %cst_15 : f32 to vector<8x256xf32>
    %40 = arith.maximumf %38, %39 : vector<8x256xf32>
    %41 = vector.extract_strided_slice %13 {offsets = [0, 512], sizes = [8, 256], strides = [1, 1]} : vector<8x1024xf32> to vector<8x256xf32>
    %42 = arith.addf %40, %41 : vector<8x256xf32>
    %c0_16 = arith.constant 0 : index
    %c512 = arith.constant 512 : index
    %43 = vector.load %arg4[%c0_16, %c512] : memref<8x1024xf32, #tpu.memory_space<vmem>>, vector<8x256xf32>
    tpu.vector_store %arg4[%c0_16, %c512], %42 {strides = array<i32>} : memref<8x1024xf32, #tpu.memory_space<vmem>>, vector<8x256xf32>,
    %44 = vector.extract_strided_slice %0 {offsets = [0, 3], sizes = [8, 1], strides = [1, 1]} : vector<8x4xf32> to vector<8x1xf32>
    %45 = vector.broadcast %44 : vector<8x1xf32> to vector<8x256xf32>
    %46 = arith.mulf %14, %45 : vector<8x256xf32>
    %47 = arith.addf %46, %16 : vector<8x256xf32>
    %cst_17 = arith.constant 0.000000e+00 : f32
    %48 = vector.broadcast %cst_17 : f32 to vector<8x256xf32>
    %49 = arith.maximumf %47, %48 : vector<8x256xf32>
    %50 = vector.extract_strided_slice %13 {offsets = [0, 768], sizes = [8, 256], strides = [1, 1]} : vector<8x1024xf32> to vector<8x256xf32>
    %51 = arith.addf %49, %50 : vector<8x256xf32>
    %c0_18 = arith.constant 0 : index
    %c768 = arith.constant 768 : index
    %52 = vector.load %arg4[%c0_18, %c768] : memref<8x1024xf32, #tpu.memory_space<vmem>>, vector<8x256xf32>
    tpu.vector_store %arg4[%c0_18, %c768], %51 {strides = array<i32>} : memref<8x1024xf32, #tpu.memory_space<vmem>>, vector<8x256xf32>,
    return
  }
  func.func @transform_0(%arg0: i32) -> (i32, i32) {
    %c0_i32 = arith.constant 0 : i32
    %c0_i32_0 = arith.constant 0 : i32
    %c0_i32_1 = arith.constant 0 : i32
    return %c0_i32, %c0_i32_0 : i32, i32
  }
  func.func @transform_1(%arg0: i32) -> (i32, i32) {
    %c0_i32 = arith.constant 0 : i32
    %c0_i32_0 = arith.constant 0 : i32
    %c0_i32_1 = arith.constant 0 : i32
    return %c0_i32, %c0_i32_0 : i32, i32
  }
  func.func @transform_2(%arg0: i32) -> (i32, i32) {
    %c0_i32 = arith.constant 0 : i32
    %c0_i32_0 = arith.constant 0 : i32
    %c0_i32_1 = arith.constant 0 : i32
    return %c0_i32, %c0_i32_0 : i32, i32
  }
  func.func @transform_3(%arg0: i32) -> (i32, i32) {
    %c0_i32 = arith.constant 0 : i32
    %c0_i32_0 = arith.constant 0 : i32
    %c0_i32_1 = arith.constant 0 : i32
    return %c0_i32, %c0_i32_0 : i32, i32
  }
}

</mosaic_0001>

<bundles_post_ra>
// kernel: idaup_forward.1
= control target key start
LH: loop header
LB: loop body
LE: loop exit
PB: predicated region body
PF: predicated region fallthrough
CT: control target
= control target key end

     0   :  { %v362_v3 = vmov 0   ;;  %v363_v10 = vmov 5   ;;  %s364_s29 = smov 120   ;;  %v365_v20 = vmov 1   ;;  %v366_v21 = vmov 2   ;;  %s457_s2 = inlined_call_operand.vmem [shape: f32[8,128], index: 2, kind: input, shape index: {}]   ;;  %s458_s1 = inlined_call_operand.vmem [shape: bf16[16,1024], index: 1, kind: input, shape index: {}]   ;;  %s459_s0 = inlined_call_operand.vmem [shape: f32[8,256], index: 0, kind: input, shape index: {}]   ;;  %s460_s3 = inlined_call_operand.vmem [shape: f32[8,1024], index: 3, kind: output, shape index: {}]  }
   0x1   :  { %v15_v0 = vld [vmem:[%s457_s2] sm:$0xff]  ;;  %104 = vmatprep.mubr.bf16.mxu0 %v362_v3  ;;  %145 = vmatprep.mubr.bf16.mxu1 %v362_v3  ;;  %v18_v6 = vld [vmem:[%s458_s1 + $0x8] sm:$0xff]  ;;  %v19_v9 = vld [vmem:[%s458_s1 + $0x10] sm:$0xff]  ;;  %v367_v22 = vmov 3   ;;  %v368_v23 = vmov 6   ;;  %v369_v24 = vmov 4  }
   0x2   :  { %v17_v1 = vld [vmem:[%s458_s1] sm:$0xff]  ;;  %v16_v4 = vpack.c.bf16 %v15_v0, %v15_v0  ;;  %v22_v7 = vld [vmem:[%s458_s1 + $0x28] sm:$0xff]  ;;  %356 = vset.pattern.permute.xlu1 %v362_v3  ;;  %355 = vset.pattern.permute.xlu0 %v363_v10  ;;  %v23_v13 = vld [vmem:[%s458_s1 + $0x30] sm:$0xff]  ;;  %vm68_vm0 = vcmask 130048  }
   0x3   :  { %v21_v2 = vld [vmem:[%s458_s1 + $0x20] sm:$0xff]  ;;  %v338_v11 = vcombine.high %v18_v6, %v22_v7  ;;  %v337_v12 = vcombine.low %v18_v6, %v22_v7  ;;  %v20_v14 = vld [vmem:[%s458_s1 + $0x18] sm:$0xff]  ;;  %276 = vperm.xlu1 %356, %v15_v0   ;;  %v339_v16 = vcombine.low %v19_v9, %v23_v13  ;;  %v340_v17 = vcombine.high %v19_v9, %v23_v13  ;;  %v270_v31 = vld [vmem:[%s459_s0 + $0x8] sm:$0xff] }
   0x4   :  { %v336_v5 = vcombine.high %v17_v1, %v21_v2  ;;  %v335_v8 = vcombine.low %v17_v1, %v21_v2  ;;  %v24_v15 = vld [vmem:[%s458_s1 + $0x38] sm:$0xff]  ;;  %26 = vrot.lane.b32.xlu0 %v16_v4, %s364_s29  ;;  %v269_v30 = vld [vmem:[%s459_s0] sm:$0xff] }
   0x5   :  { %v341_v18 = vcombine.low %v20_v14, %v24_v15  ;;  %127 = vmatprep.subr.bf16.mxu1 %v338_v11  ;;  %v342_v19 = vcombine.high %v20_v14, %v24_v15 }
   0x6   :  { %86 = vmatprep.subr.bf16.mxu0 %v336_v5  ;;  %128 = vmatpush1.bf16.msra.mxu1 %v337_v12 }
   0x7   :  { %87 = vmatpush1.bf16.msra.mxu0 %v335_v8  ;;  %209 = vmatprep.subr.bf16.mxu1 %v342_v19 }
   0x8   :  { %168 = vmatprep.subr.bf16.mxu0 %v340_v17  ;;  %357 = vset.pattern.permute.xlu1 %v365_v20 }
   0x9   :  { %290 = vperm.xlu1 %357, %v15_v0   ;;  %238 = vperm.xlu0 %355, %v15_v0  }
   0xd   :  { %358 = vset.pattern.permute.xlu1 %v366_v21  ;;  %359 = vset.pattern.permute.xlu0 %v367_v22 }
   0xe   :  { %304 = vperm.xlu1 %358, %v15_v0   ;;  %318 = vperm.xlu0 %359, %v15_v0  }
  0x12   :  { %360 = vset.pattern.permute.xlu1 %v368_v23 }
  0x13   :  { %250 = vperm.xlu1 %360, %v15_v0  }
  0x17   :  { %361 = vset.pattern.permute.xlu1 %v369_v24 }
  0x18   :  { %272 = vperm.xlu1 %361, %v15_v0  }
  0x76   :  { %v27_v25 = vpop.permute.xlu0 %26 }
  0x77   :  { %343 = vmatmul.mubr.msk.bf16.vlgmr.msra.gmra.mxu0 %vm68_vm0, %v27_v25  ;;  %344 = vmatmul.mubr.msk.bf16.vlgmr.msra.gmra.mxu1 %vm68_vm0, %v27_v25 }
  0x78   :  { %169 = vmatpush1.bf16.msra.mxu0 %v339_v16  ;;  %210 = vmatpush1.bf16.msra.mxu1 %v341_v18 }
  0x79   :  { %186 = vmatprep.mubr.bf16.mxu0 %v362_v3  ;;  %227 = vmatprep.mubr.bf16.mxu1 %v362_v3 }
  0x7e   :  { %v277_v26 = vpop.permute.xlu1 %276 }
  0x7f   :  { %345 = vmatmul.mubr.msk.bf16.vlgmr.msra.gmra.mxu0 %vm68_vm0, %v27_v25  ;;  %346 = vmatmul.mubr.msk.bf16.vlgmr.msra.gmra.mxu1 %vm68_vm0, %v27_v25  ;;  %v279_v33 = vmul.f32 %v277_v26, %v269_v30  ;;  %v280_v36 = vmul.f32 %v277_v26, %v270_v31 }
  0x84   :  { %v291_v27 = vpop.permute.xlu1 %290  ;;  %v239_v32 = vpop.permute.xlu0 %238 }
  0x85   :  { %v293_v34 = vmul.f32 %v291_v27, %v269_v30  ;;  %v294_v37 = vmul.f32 %v291_v27, %v270_v31 }
  0x89   :  { %v305_v28 = vpop.permute.xlu1 %304  ;;  %v319_v38 = vpop.permute.xlu0 %318 }
  0x8a   :  { %v321_v49 = vmul.f32 %v319_v38, %v269_v30  ;;  %v307_v54 = vmul.f32 %v305_v28, %v269_v30  ;;  %v322_v59 = vmul.f32 %v319_v38, %v270_v31  ;;  %v308_v0 = vmul.f32 %v305_v28, %v270_v31 }
  0x8e   :  { %v417_v29 = vpop.permute.xlu1 %250 }
  0x93   :  { %v273_v35 = vpop.permute.xlu1 %272 }
  0x94   :  { %v281_v40 = vadd.f32 %v279_v33, %v273_v35  ;;  %v295_v42 = vadd.f32 %v293_v34, %v273_v35  ;;  %v282_v46 = vadd.f32 %v280_v36, %v273_v35  ;;  %v296_v48 = vadd.f32 %v294_v37, %v273_v35 }
  0x95   :  { %v323_v5 = vadd.f32 %v321_v49, %v273_v35  ;;  %v324_v10 = vadd.f32 %v322_v59, %v273_v35  ;;  %v309_v12 = vadd.f32 %v307_v54, %v273_v35  ;;  %v310_v20 = vadd.f32 %v308_v0, %v273_v35 }
  0x96   :  { %v283_v55 = vmax.f32 %v281_v40, 0.0  ;;  %v297_v56 = vmax.f32 %v295_v42, 0.0  ;;  %v284_v1 = vmax.f32 %v282_v46, 0.0  ;;  %v298_v2 = vmax.f32 %v296_v48, 0.0 }
  0x97   :  { %v325_v18 = vmax.f32 %v323_v5, 0.0  ;;  %v326_v26 = vmax.f32 %v324_v10, 0.0  ;;  %v311_v27 = vmax.f32 %v309_v12, 0.0  ;;  %v312_v36 = vmax.f32 %v310_v20, 0.0 }
 0x137   :  { %v106_v39 = vpop.f32.mrf.mxu0  ;;  %v147_v41 = vpop.f32.mrf.mxu1 }
 0x138   :  { %v241_v43 = vmul.f32 %v239_v32, %v106_v39  ;;  %v243_v44 = vmul.f32 %v239_v32, %v147_v41 }
 0x139   :  { %v108_v45 = vpop.f32.mrf.mxu0  ;;  %v149_v47 = vpop.f32.mrf.mxu1 }
 0x13a   :  { %v253_v50 = vadd.f32 %v417_v29, %v241_v43  ;;  %v255_v51 = vadd.f32 %v417_v29, %v243_v44  ;;  %v242_v52 = vmul.f32 %v239_v32, %v108_v45  ;;  %v244_v53 = vmul.f32 %v239_v32, %v149_v47 }
 0x13b   :  { %v110_v57 = vpop.f32.mrf.mxu0  ;;  %v151_v58 = vpop.f32.mrf.mxu1 }
 0x13c   :  { %v261_v60 = vmax.f32 %v253_v50, 0.0  ;;  %v263_v61 = vmax.f32 %v255_v51, 0.0  ;;  %v254_v62 = vadd.f32 %v417_v29, %v242_v52  ;;  %v256_v63 = vadd.f32 %v417_v29, %v244_v53 }
 0x13d   :  { %v111_v3 = vpop.f32.mrf.mxu0  ;;  %v152_v4 = vpop.f32.mrf.mxu1 }
 0x13e   :  { %v285_v6 = vadd.f32 %v283_v55, %v261_v60  ;;  %v299_v7 = vadd.f32 %v297_v56, %v263_v61  ;;  %v262_v8 = vmax.f32 %v254_v62, 0.0  ;;  %v264_v9 = vmax.f32 %v256_v63, 0.0 }
 0x13f   :  { %v188_v11 = vpop.f32.mrf.mxu0  ;;  %v229_v13 = vpop.f32.mrf.mxu1 }
 0x140   :  { %287 = vst [vmem:[%s460_s3] sm:$0xff] %v285_v6  ;;  %301 = vst [vmem:[%s460_s3 + $0x10] sm:$0xff] %v299_v7  ;;  %v286_v14 = vadd.f32 %v284_v1, %v262_v8  ;;  %v300_v15 = vadd.f32 %v298_v2, %v264_v9  ;;  %v245_v16 = vmul.f32 %v239_v32, %v188_v11 }
 0x141   :  { %v247_v17 = vmul.f32 %v239_v32, %v229_v13  ;;  %v190_v19 = vpop.f32.mrf.mxu0  ;;  %v231_v21 = vpop.f32.mrf.mxu1 }
 0x142   :  { %288 = vst [vmem:[%s460_s3 + $0x8] sm:$0xff] %v286_v14  ;;  %302 = vst [vmem:[%s460_s3 + $0x18] sm:$0xff] %v300_v15  ;;  %v257_v22 = vadd.f32 %v417_v29, %v245_v16  ;;  %v246_v24 = vmul.f32 %v239_v32, %v190_v19  ;;  %v248_v25 = vmul.f32 %v239_v32, %v231_v21 }
 0x143   :  { %v259_v23 = vadd.f32 %v417_v29, %v247_v17  ;;  %v192_v28 = vpop.f32.mrf.mxu0  ;;  %v233_v30 = vpop.f32.mrf.mxu1 }
 0x144   :  { %v265_v31 = vmax.f32 %v257_v22, 0.0  ;;  %v258_v34 = vadd.f32 %v417_v29, %v246_v24  ;;  %v260_v35 = vadd.f32 %v417_v29, %v248_v25 }
 0x145   :  { %v267_v33 = vmax.f32 %v259_v23, 0.0  ;;  %v193_v37 = vpop.f32.mrf.mxu0  ;;  %v234_v38 = vpop.f32.mrf.mxu1 }
 0x146   :  { %v313_v39 = vadd.f32 %v311_v27, %v265_v31  ;;  %v266_v41 = vmax.f32 %v258_v34, 0.0  ;;  %v268_v42 = vmax.f32 %v260_v35, 0.0 }
 0x147   :  { %v327_v40 = vadd.f32 %v325_v18, %v267_v33 }
 0x148   :  { %315 = vst [vmem:[%s460_s3 + $0x20] sm:$0xff] %v313_v39  ;;  %v314_v32 = vadd.f32 %v312_v36, %v266_v41  ;;  %v328_v43 = vadd.f32 %v326_v26, %v268_v42 }
 0x149   :  { %329 = vst [vmem:[%s460_s3 + $0x30] sm:$0xff] %v327_v40 }
 0x14a   :  { %316 = vst [vmem:[%s460_s3 + $0x28] sm:$0xff] %v314_v32  ;;  %330 = vst [vmem:[%s460_s3 + $0x38] sm:$0xff] %v328_v43 }

</bundles_post_ra>
